<compile_context>
chip_gen: v7x
topology: tpu7x:2x2x1
jax: 0.10.0
libtpu: 0.0.40
codegen_flags: <defaults>
</compile_context>

<pallas_src>
import functools

import jax
import jax.numpy as jnp
from jax.experimental import pallas as pl
from jax.experimental.pallas import tpu as pltpu


_C_PAD = 128                      # lane-dense class padding (output width)
_VMEM_BUDGET = 28 * 1024 * 1024   # working-set budget (fits v7x 64 MiB w/ headroom)
_W_BUDGET = 12 * 1024 * 1024      # max bf16 W bytes kept fully resident before K-tiling
_MAX_TM = 512                     # batch tile cap (near HBM roofline), multiple of 8


def _cdiv(a, b):
    return -(-a // b)


def _round_up(x, m):
    return _cdiv(x, m) * m


def _k_plan(f):
    """Feature (K) tiling plan -> (tk, nk). Single step with W resident if it fits."""
    if f * _C_PAD * 2 <= _W_BUDGET:                               # bf16 W fully resident
        return f, 1
    tk = max(128, (_W_BUDGET // (2 * _C_PAD * 2)) // 128 * 128)   # double-buffered W tiles
    return tk, _cdiv(f, tk)


def prepare_weights(w, b):
    """One-time weight packing (off the per-call path): pad classes to 128 lanes,
    pad K to the K-tile, cast W to bf16 for streaming."""
    f, c = w.shape
    tk, nk = _k_plan(f)
    f_pad = tk * nk
    w_p = jnp.zeros((f_pad, _C_PAD), jnp.bfloat16).at[:f, :c].set(
        w.astype(jnp.bfloat16))
    b_p = jnp.zeros((1, _C_PAD), jnp.float32).at[:, :c].set(
        b.astype(jnp.float32).reshape(1, c))
    return w_p, b_p


def _make_kernel(f, tk):
    ragged_k = (f % tk) != 0

    def kernel(temp_ref, x_ref, w_ref, b_ref, o_ref, acc_ref):
        # temp_ref: SMEM (1,)   x_ref: (TM, TK) bf16   w_ref: (TK, 128) bf16
        # b_ref:    (1, 128) f32   o_ref: (TM, 128) f32   acc_ref: (TM, 128) f32
        k = pl.program_id(1)

        @pl.when(k == 0)
        def _init():
            acc_ref[...] = jnp.zeros_like(acc_ref)

        x = x_ref[...]
        if ragged_k:
            # Last K tile reads past F: zero the out-of-range columns so stale
            # VMEM garbage (incl. NaN) can never reach the accumulator.
            col = jax.lax.broadcasted_iota(jnp.int32, x_ref.shape, 1)
            x = jnp.where(k * tk + col < f, x, jnp.zeros_like(x))

        acc_ref[...] += jnp.dot(x, w_ref[...],
                                preferred_element_type=jnp.float32)

        @pl.when(k == pl.num_programs(1) - 1)
        def _finalize():
            inv_t = 1.0 / temp_ref[0]                  # scalar from SMEM
            o_ref[...] = ((acc_ref[...] + b_ref[...]) * inv_t).astype(o_ref.dtype)

    return kernel


@functools.partial(jax.jit, static_argnames=("num_classes",))
def model_with_temperature(x_nchw, w_p, b_p, temperature, *, num_classes):
    """x_nchw: [N, C, H, W]; (w_p, b_p) from prepare_weights; temperature: scalar.
    Returns logits / temperature, shape [N, num_classes] (f32)."""
    n = x_nchw.shape[0]
    # glue: NCHW row-major flatten; bf16 stream (f32 accumulation in-kernel)
    x_flat = x_nchw.reshape(n, -1).astype(jnp.bfloat16)
    f = x_flat.shape[1]

    tk, nk = _k_plan(f)
    assert w_p.shape == (tk * nk, _C_PAD), "weights must come from prepare_weights"

    # ---- batch (M) tile: sized to the VMEM budget, multiple of 8 sublanes ----
    resident = 2 * tk * _C_PAD * 2 + 2 * _C_PAD * 4           # W + bias (dbl-buffered)
    per_row = 2 * tk * 2 + 2 * _C_PAD * 4 + _C_PAD * 4        # x + out (dbl-buf) + acc
    tm = min(_MAX_TM, max(8, (_VMEM_BUDGET - resident) // per_row))
    tm = max(8, (tm // 8) * 8)
    tm = min(tm, _round_up(n, 8))                              # no over-tiling tiny batches
    if n > 8:
        # Ensure >=2 batch tiles so the "parallel" axis shards across v7x's 2 TCs.
        tm = min(tm, max(8, _round_up(_cdiv(n, 2), 8)))

    n_out = _round_up(n, 8)                                    # sublane-aligned output slab
    grid = (_cdiv(n_out, tm), nk)

    # vmem limit from the real footprint (+ headroom for compiler internals)
    footprint = (2 * tm * tk * 2          # x tiles   (bf16, double-buffered)
                 + 2 * tk * _C_PAD * 2    # W tiles   (bf16, double-buffered)
                 + 2 * _C_PAD * 4         # bias
                 + 2 * tm * _C_PAD * 4    # out tiles (f32, double-buffered)
                 + tm * _C_PAD * 4)       # accumulator scratch
    vmem_limit = int(min(48 * 1024 * 1024, footprint + 8 * 1024 * 1024))

    temp = jnp.asarray(temperature, jnp.float32).reshape(1)

    cost = pl.CostEstimate(
        flops=2 * n_out * f * _C_PAD,
        transcendentals=0,
        bytes_accessed=n * f * 2 + tk * nk * _C_PAD * 2 + n_out * _C_PAD * 4,
    )

    out = pl.pallas_call(
        _make_kernel(f, tk),
        out_shape=jax.ShapeDtypeStruct((n_out, _C_PAD), jnp.float32),
        grid_spec=pltpu.PrefetchScalarGridSpec(
            num_scalar_prefetch=0,
            grid=grid,
            in_specs=[
                pl.BlockSpec(memory_space=pltpu.MemorySpace.SMEM),  # temperature (1,)
                pl.BlockSpec((tm, tk), lambda i, k: (i, k)),        # x: streamed tile
                pl.BlockSpec((tk, _C_PAD), lambda i, k: (k, 0)),    # W: K-tiled / resident
                pl.BlockSpec((1, _C_PAD), lambda i, k: (0, 0)),     # bias: resident
            ],
            out_specs=pl.BlockSpec((tm, _C_PAD), lambda i, k: (i, 0)),
            scratch_shapes=[pltpu.VMEM((tm, _C_PAD), jnp.float32)],
        ),
        compiler_params=pltpu.CompilerParams(
            dimension_semantics=("parallel", "arbitrary"),
            vmem_limit_bytes=vmem_limit,
        ),
        cost_estimate=cost,
    )(temp, x_flat, w_p, b_p)

    return out[:n, :num_classes]                               # strip batch/class padding


if __name__ == "__main__":
    key = jax.random.PRNGKey(0)
    kx, kw, kb = jax.random.split(key, 3)

    # small shapes consistent with an NCHW image classifier
    N, C, H, W = 2, 4, 16, 16
    NUM_CLASSES = 10
    F = C * H * W

    x = jax.random.normal(kx, (N, C, H, W), dtype=jnp.float32)
    w = jax.random.normal(kw, (F, NUM_CLASSES), dtype=jnp.float32) * 0.02
    b = jax.random.normal(kb, (NUM_CLASSES,), dtype=jnp.float32) * 0.1
    temperature = jnp.float32(1.5)     # nn.Parameter(torch.ones(1) * 1.5)

    w_p, b_p = prepare_weights(w, b)   # one-time packing, off the hot path
    out = model_with_temperature(x, w_p, b_p, temperature, num_classes=NUM_CLASSES)
    out = jax.block_until_ready(out)

    # reference in plain JAX (same bf16-operand / f32-accumulate math as the MXU)
    xb = x.reshape(N, -1).astype(jnp.bfloat16).astype(jnp.float32)
    wb = w.astype(jnp.bfloat16).astype(jnp.float32)
    ref = (xb @ wb + b) / temperature

    assert out.shape == (N, NUM_CLASSES)
    assert jnp.allclose(out, ref, atol=1e-2, rtol=1e-2)

    print("KERNEL_OK")
</pallas_src>

<mosaic_0001>
module attributes {stable_mosaic.version = 11 : i64} {
  func.func @kernel(%arg0: i32, %arg1: i32, %arg2: memref<1xf32, #tpu.memory_space<smem>>, %arg3: memref<8x1024xbf16, #tpu.memory_space<vmem>>, %arg4: memref<1024x128xbf16, #tpu.memory_space<vmem>>, %arg5: memref<1x128xf32, #tpu.memory_space<vmem>>, %arg6: memref<8x128xf32, #tpu.memory_space<vmem>>, %arg7: memref<8x128xf32, #tpu.memory_space<vmem>>) attributes {dimension_semantics = [#tpu.dimension_semantics<parallel>, #tpu.dimension_semantics<arbitrary>], iteration_bounds = array<i64: 1, 1>, scalar_prefetch = 0 : i64, scratch_operands = 1 : i64, tpu.core_type = #tpu.core_type<tc>, window_params = [{transform_indices = @transform_0, window_bounds = array<i64: 1>}, {transform_indices = @transform_1, window_bounds = array<i64: 8, 1024>}, {transform_indices = @transform_2, window_bounds = array<i64: 1024, 128>}, {pipeline_mode = #tpu.pipeline_mode<synchronous>, transform_indices = @transform_3, window_bounds = array<i64: 1, 128>}, {transform_indices = @transform_4, window_bounds = array<i64: 8, 128>}]} {
    %c0_i32 = arith.constant 0 : i32
    %0 = arith.cmpi eq, %arg1, %c0_i32 : i32
    %1 = arith.extui %0 : i1 to i32
    %c0_i32_0 = arith.constant 0 : i32
    %2 = arith.cmpi ne, %1, %c0_i32_0 : i32
    scf.if %2 {
      %cst_10 = arith.constant 0.000000e+00 : f32
      %12 = vector.broadcast %cst_10 : f32 to vector<8x128xf32>
      %c0_11 = arith.constant 0 : index
      %c0_12 = arith.constant 0 : index
      %13 = vector.load %arg7[%c0_11, %c0_12] : memref<8x128xf32, #tpu.memory_space<vmem>>, vector<8x128xf32>
      tpu.vector_store %arg7[%c0_11, %c0_12], %12 {strides = array<i32>} : memref<8x128xf32, #tpu.memory_space<vmem>>, vector<8x128xf32>,
    } else {
    }
    %c0 = arith.constant 0 : index
    %c0_1 = arith.constant 0 : index
    %3 = vector.load %arg3[%c0, %c0_1] : memref<8x1024xbf16, #tpu.memory_space<vmem>>, vector<8x1024xbf16>
    %c0_2 = arith.constant 0 : index
    %c0_3 = arith.constant 0 : index
    %4 = vector.load %arg7[%c0_2, %c0_3] : memref<8x128xf32, #tpu.memory_space<vmem>>, vector<8x128xf32>
    %c0_4 = arith.constant 0 : index
    %c0_5 = arith.constant 0 : index
    %5 = vector.load %arg4[%c0_4, %c0_5] : memref<1024x128xbf16, #tpu.memory_space<vmem>>, vector<1024x128xbf16>
    %cst = arith.constant dense<0.000000e+00> : vector<8x128xf32>
    %6 = tpu.matmul %3, %5, %cst {dimension_numbers = #tpu.dot_dimension_numbers<[1], [0], [0], [1], [0, 0, 1, 1], [], []>} : vector<8x1024xbf16>, vector<1024x128xbf16>, vector<8x128xf32> -> vector<8x128xf32>
    %7 = arith.addf %4, %6 : vector<8x128xf32>
    %c0_6 = arith.constant 0 : index
    %c0_7 = arith.constant 0 : index
    %8 = vector.load %arg7[%c0_6, %c0_7] : memref<8x128xf32, #tpu.memory_space<vmem>>, vector<8x128xf32>
    tpu.vector_store %arg7[%c0_6, %c0_7], %7 {strides = array<i32>} : memref<8x128xf32, #tpu.memory_space<vmem>>, vector<8x128xf32>,
    %c0_i32_8 = arith.constant 0 : i32
    %9 = arith.cmpi eq, %arg1, %c0_i32_8 : i32
    %10 = arith.extui %9 : i1 to i32
    %c0_i32_9 = arith.constant 0 : i32
    %11 = arith.cmpi ne, %10, %c0_i32_9 : i32
    scf.if %11 {
      %c0_10 = arith.constant 0 : index
      %12 = memref.load %arg2[%c0_10] : memref<1xf32, #tpu.memory_space<smem>>
      %cst_11 = arith.constant 1.000000e+00 : f32
      %13 = arith.divf %cst_11, %12 : f32
      %c0_12 = arith.constant 0 : index
      %c0_13 = arith.constant 0 : index
      %14 = vector.load %arg7[%c0_12, %c0_13] : memref<8x128xf32, #tpu.memory_space<vmem>>, vector<8x128xf32>
      %c0_14 = arith.constant 0 : index
      %c0_15 = arith.constant 0 : index
      %15 = vector.load %arg5[%c0_14, %c0_15] : memref<1x128xf32, #tpu.memory_space<vmem>>, vector<1x128xf32>
      %16 = vector.broadcast %15 : vector<1x128xf32> to vector<8x128xf32>
      %17 = arith.addf %14, %16 : vector<8x128xf32>
      %18 = vector.broadcast %13 : f32 to vector<8x128xf32>
      %19 = arith.mulf %17, %18 : vector<8x128xf32>
      %c0_16 = arith.constant 0 : index
      %c0_17 = arith.constant 0 : index
      %20 = vector.load %arg6[%c0_16, %c0_17] : memref<8x128xf32, #tpu.memory_space<vmem>>, vector<8x128xf32>
      tpu.vector_store %arg6[%c0_16, %c0_17], %19 {strides = array<i32>} : memref<8x128xf32, #tpu.memory_space<vmem>>, vector<8x128xf32>,
    } else {
    }
    return
  }
  func.func @transform_0(%arg0: i32, %arg1: i32) -> i32 {
    %c0_i32 = arith.constant 0 : i32
    %c0_i32_0 = arith.constant 0 : i32
    return %c0_i32 : i32
  }
  func.func @transform_1(%arg0: i32, %arg1: i32) -> (i32, i32) {
    %c0_i32 = arith.constant 0 : i32
    return %arg0, %arg1 : i32, i32
  }
  func.func @transform_2(%arg0: i32, %arg1: i32) -> (i32, i32) {
    %c0_i32 = arith.constant 0 : i32
    %c0_i32_0 = arith.constant 0 : i32
    return %arg1, %c0_i32 : i32, i32
  }
  func.func @transform_3(%arg0: i32, %arg1: i32) -> (i32, i32) {
    %c0_i32 = arith.constant 0 : i32
    %c0_i32_0 = arith.constant 0 : i32
    %c0_i32_1 = arith.constant 0 : i32
    return %c0_i32, %c0_i32_0 : i32, i32
  }
  func.func @transform_4(%arg0: i32, %arg1: i32) -> (i32, i32) {
    %c0_i32 = arith.constant 0 : i32
    %c0_i32_0 = arith.constant 0 : i32
    return %arg0, %c0_i32 : i32, i32
  }
}

</mosaic_0001>

<bundles_post_ra>
// kernel: model_with_temperature.1
= control target key start
LH: loop header
LB: loop body
LE: loop exit
PB: predicated region body
PF: predicated region fallthrough
CT: control target
= control target key end

     0   :  { %10 = vsyncpa [#allocation5], 0  ;;  %s1076_s15 = smov [#allocation4]   ;;  %s1156_s0 = inlined_call_operand.<no memory space> [shape: f32[1], index: 0, kind: input, shape index: {}]   ;;  %s1157_s1 = inlined_call_operand.vmem [shape: bf16[2,1024], index: 1, kind: input, shape index: {}]   ;;  %s1158_s2 = inlined_call_operand.hbm [shape: bf16[1024,128], index: 2, kind: input, shape index: {}]   ;;  %s1159_s3 = inlined_call_operand.vmem [shape: f32[1,128], index: 3, kind: input, shape index: {}]   ;;  %s1160_s4 = inlined_call_operand.vmem [shape: f32[8,128], index: 4, kind: output, shape index: {}]  }
   0x1   :  { %s20_s16 = sshll.u32 %s1076_s15, 4  ;;  %s1052_s19 = scalar_lea.hbm %s1158_s2, 8192  ;;  %s21_s16 = int_to_ptr.vmem [resolvable:$true] %s20_s16 }
   0x2   :  { %p1053_p0 = scmp.ne.s32.totalorder %s1158_s2, %s1052_s19  ;;  %p1056_p1 = scmp.lt.u32.totalorder %s1052_s19, %s1158_s2 }
   0x4   :  { %p1058_p2 = pnand %p1056_p1, %p1053_p0 }
   0x6   :  { %1061 = shalt.err (!%p1058_p2)
}
   0x7   :  { %s1062_s24 = scalar_lea.vmem %s21_s16, 8192  ;;  %p1067_p4 = scmp.lt.s32.totalorder %s21_s16, %s21_s16 }
   0x8   :  { %p1063_p3 = scmp.ne.s32.totalorder %s21_s16, %s1062_s24  ;;  %p1068_p5 = scmp.lt.s32.totalorder %s1062_s24, %s1062_s24 }
   0xa   :  { %p1069_p6 = por %p1068_p5, %p1067_p4 }
   0xc   :  { %p1070_p7 = pnand %p1069_p6, %p1063_p3 }
   0xe   :  { %1073 = shalt.err (!%p1070_p7)
}
   0xf   :  { %s1077_s25 = smov 64   ;;  %s1078_s26 = smov 4  }
  0x10   :  { %26 = dma.hbm_to_vmem [thread:$0]  %s1158_s2, 8192, %s21_s16, [#allocation5], %s1077_s25, %s1077_s25, %s1078_s26  }
  0x11   :  { %1074 = dma.done.wait [#allocation5], 8192  }
  0x12   :  { %1075 = vsyncadd [#allocation5], 4294959104  ;;  %v801_v0 = vstv %s1156_s0  ;;  %v980_v1 = vld [vmem:[#allocation4 + $0x40] sm:$0xff]   ;;  %v984_v6 = vld [vmem:[#allocation4 + $0x48] sm:$0xff]   ;;  %v1079_v26 = vmov 1966171168   ;;  %v182_v28 = vlaneseq }
  0x13   :  { %1050 = vrcp.f32 %v801_v0  ;;  %v981_v2 = vld [vmem:[#allocation4 + $0xc0] sm:$0xff]   ;;  %886 = vmatprep.subr.bf16.mxu0 %v980_v1  ;;  %v985_v7 = vld [vmem:[#allocation4 + $0xc8] sm:$0xff]   ;;  %v988_v10 = vld [vmem:[#allocation4 + $0x50] sm:$0xff]   ;;  %v180_v27 = vunpack.c.l.s4 %v1079_v26 }
  0x14   :  { %v982_v3 = vld [vmem:[#allocation4] sm:$0xff]   ;;  %908 = vmatprep.subr.bf16.mxu1 %v981_v2  ;;  %v986_v8 = vld [vmem:[#allocation4 + $0x8] sm:$0xff]   ;;  %v989_v11 = vld [vmem:[#allocation4 + $0xd0] sm:$0xff]   ;;  %v183_v34 = vshrl.u32 %v182_v28, 7 }
  0x15   :  { %v983_v4 = vld [vmem:[#allocation4 + $0x80] sm:$0xff]   ;;  %887 = vmatpush3.bf16.msra.mxu0 %v982_v3  ;;  %v987_v9 = vld [vmem:[#allocation4 + $0x88] sm:$0xff]   ;;  %v990_v12 = vld [vmem:[#allocation4 + $0x10] sm:$0xff]   ;;  %v181_v33 = vunpack.c.0.s8 %v180_v27 }
  0x16   :  { %909 = vmatpush3.bf16.msra.mxu1 %v983_v4  ;;  %888 = vmatprep.subr.bf16.mxu0 %v984_v6  ;;  %v991_v13 = vld [vmem:[#allocation4 + $0x90] sm:$0xff]   ;;  %v992_v14 = vld [vmem:[#allocation4 + $0x58] sm:$0xff]   ;;  %v996_v18 = vld [vmem:[#allocation4 + $0x60] sm:$0xff]  }
  0x17   :  { %910 = vmatprep.subr.bf16.mxu1 %v985_v7  ;;  %v993_v15 = vld [vmem:[#allocation4 + $0xd8] sm:$0xff]   ;;  %v997_v19 = vld [vmem:[#allocation4 + $0xe0] sm:$0xff]   ;;  %v1000_v22 = vld [vmem:[#allocation4 + $0x68] sm:$0xff]   ;;  %v1120_v39 = vsub.s32 %v181_v33, %v183_v34 }
  0x18   :  { %v994_v16 = vld [vmem:[#allocation4 + $0x18] sm:$0xff]   ;;  %v998_v20 = vld [vmem:[#allocation4 + $0x20] sm:$0xff]   ;;  %v1001_v23 = vld [vmem:[#allocation4 + $0xe8] sm:$0xff]  }
  0x19   :  { %889 = vmatpush3.bf16.msra.mxu0 %v986_v8  ;;  %v995_v17 = vld [vmem:[#allocation4 + $0x98] sm:$0xff]   ;;  %v999_v21 = vld [vmem:[#allocation4 + $0xa0] sm:$0xff]   ;;  %v1002_v24 = vld [vmem:[#allocation4 + $0x28] sm:$0xff]  }
  0x1a   :  { %911 = vmatpush3.bf16.msra.mxu1 %v987_v9  ;;  %890 = vmatprep.subr.bf16.mxu0 %v988_v10  ;;  %v1003_v25 = vld [vmem:[#allocation4 + $0xa8] sm:$0xff]   ;;  %v1004_v29 = vld [vmem:[#allocation4 + $0x70] sm:$0xff]   ;;  %v1008_v35 = vld [vmem:[#allocation4 + $0x78] sm:$0xff]  }
  0x1b   :  { %912 = vmatprep.subr.bf16.mxu1 %v989_v11  ;;  %v1005_v30 = vld [vmem:[#allocation4 + $0xf0] sm:$0xff]   ;;  %v1009_v36 = vld [vmem:[#allocation4 + $0xf8] sm:$0xff]   ;;  %v1012_v40 = vld [vmem:[%s1157_s1] ss:$8 sps:$4 sm:$0xff]  }
  0x1c   :  { %v1006_v31 = vld [vmem:[#allocation4 + $0x30] sm:$0xff]   ;;  %v1010_v37 = vld [vmem:[#allocation4 + $0x38] sm:$0xff]   ;;  %v1014_v41 = vld [vmem:[%s1157_s1 + $0x4] ss:$8 sps:$4 sm:$0xff]   ;;  %v185_v44 = vrot.slane %v1012_v40, %v1120_v39 }
  0x1d   :  { %v1051_v5 = vpop.eup %1050  ;;  %891 = vmatpush3.bf16.msra.mxu0 %v990_v12  ;;  %v1007_v32 = vld [vmem:[#allocation4 + $0xb0] sm:$0xff]   ;;  %v1011_v38 = vld [vmem:[#allocation4 + $0xb8] sm:$0xff]   ;;  %v1018_v45 = vld [vmem:[#allocation4 + $0x140] sm:$0xff]   ;;  %v1136_v46 = vrot.slane %v1014_v41, %v1120_v39 }
  0x1e   :  { %974 = vpush %v1051_v5  ;;  %913 = vmatpush3.bf16.msra.mxu1 %v991_v13  ;;  %892 = vmatprep.subr.bf16.mxu0 %v992_v14  ;;  %v1015_v42 = vld [vmem:[%s1157_s1 + $0x10] ss:$8 sps:$4 sm:$0xff]   ;;  %v1017_v43 = vld [vmem:[%s1157_s1 + $0x14] ss:$8 sps:$4 sm:$0xff]   ;;  %v1019_v48 = vld [vmem:[#allocation4 + $0x1c0] sm:$0xff]  }
  0x1f   :  { %914 = vmatprep.subr.bf16.mxu1 %v993_v15  ;;  %v199_v47 = vrot.slane %v1015_v42, %v1120_v39  ;;  %v1140_v49 = vrot.slane %v1017_v43, %v1120_v39  ;;  %v1020_v55 = vld [vmem:[#allocation4 + $0x100] sm:$0xff]   ;;  %v1022_v57 = vld [vmem:[#allocation4 + $0x148] sm:$0xff]   ;;  %v1026_v0 = vld [vmem:[#allocation4 + $0x150] sm:$0xff]  }
  0x20   :  { %v1021_v60 = vld [vmem:[#allocation4 + $0x180] sm:$0xff]   ;;  %v1023_v61 = vld [vmem:[#allocation4 + $0x1c8] sm:$0xff]   ;;  %v1027_v2 = vld [vmem:[#allocation4 + $0x1d0] sm:$0xff]  }
  0x21   :  { %893 = vmatpush3.bf16.msra.mxu0 %v994_v16  ;;  %v208_v50 = vcombine.high %v185_v44, %v199_v47  ;;  %v207_v51 = vcombine.low %v185_v44, %v199_v47  ;;  %v210_v52 = vcombine.high %v1136_v46, %v1140_v49  ;;  %v1024_v63 = vld [vmem:[#allocation4 + $0x108] sm:$0xff]   ;;  %v1028_v3 = vld [vmem:[#allocation4 + $0x110] sm:$0xff]   ;;  %v1030_v4 = vld [vmem:[#allocation4 + $0x158] sm:$0xff]  }
  0x22   :  { %915 = vmatpush3.bf16.msra.mxu1 %v995_v17  ;;  %894 = vmatprep.subr.bf16.mxu0 %v996_v18  ;;  %v1025_v1 = vld [vmem:[#allocation4 + $0x188] sm:$0xff]   ;;  %v1029_v5 = vld [vmem:[#allocation4 + $0x190] sm:$0xff]   ;;  %v1031_v6 = vld [vmem:[#allocation4 + $0x1d8] sm:$0xff]  }
  0x23   :  { %916 = vmatprep.subr.bf16.mxu1 %v997_v19  ;;  %v231_v53 = vrot.slane %v208_v50, %v1120_v39  ;;  %v217_v54 = vrot.slane %v207_v51, %v1120_v39  ;;  %v238_v56 = vrot.slane %v210_v52, %v1120_v39  ;;  %v1032_v7 = vld [vmem:[#allocation4 + $0x118] sm:$0xff]   ;;  %v1034_v8 = vld [vmem:[#allocation4 + $0x160] sm:$0xff]   ;;  %v1038_v12 = vld [vmem:[#allocation4 + $0x168] sm:$0xff]  }
  0x24   :  { %v1033_v9 = vld [vmem:[#allocation4 + $0x198] sm:$0xff]   ;;  %v1035_v10 = vld [vmem:[#allocation4 + $0x1e0] sm:$0xff]   ;;  %v1039_v14 = vld [vmem:[#allocation4 + $0x1e8] sm:$0xff]  }
  0x25   :  { %895 = vmatpush3.bf16.msra.mxu0 %v998_v20  ;;  %667 = vmatprep.mubr.bf16.mxu0 %v231_v53  ;;  %v241_v58 = vcombine.high %v231_v53, %v231_v53  ;;  %v239_v59 = vcombine.high %v217_v54, %v217_v54  ;;  %v242_v62 = vcombine.high %v238_v56, %v238_v56  ;;  %v1036_v11 = vld [vmem:[#allocation4 + $0x120] sm:$0xff]   ;;  %v1040_v15 = vld [vmem:[#allocation4 + $0x128] sm:$0xff]   ;;  %v1042_v16 = vld [vmem:[#allocation4 + $0x170] sm:$0xff]  }
  0x26   :  { %917 = vmatpush3.bf16.msra.mxu1 %v999_v21  ;;  %896 = vmatprep.subr.bf16.mxu0 %v1000_v22  ;;  %v1037_v13 = vld [vmem:[#allocation4 + $0x1a0] sm:$0xff]   ;;  %v1041_v17 = vld [vmem:[#allocation4 + $0x1a8] sm:$0xff]   ;;  %v1043_v18 = vld [vmem:[#allocation4 + $0x1f0] sm:$0xff]   ;;  %v209_v21 = vcombine.low %v1136_v46, %v1140_v49 }
  0x27   :  { %918 = vmatprep.subr.bf16.mxu1 %v1001_v23  ;;  %707 = vmatprep.mubr.bf16.mxu1 %v241_v58  ;;  %v1044_v19 = vld [vmem:[#allocation4 + $0x130] sm:$0xff]   ;;  %v1046_v20 = vld [vmem:[#allocation4 + $0x178] sm:$0xff]   ;;  %v885_v50 = vld [vmem:[%s1159_s3] ss:$0 sm:$0xff] }
  0x28   :  { %v1045_v22 = vld [vmem:[#allocation4 + $0x1b0] sm:$0xff]   ;;  %v1047_v23 = vld [vmem:[#allocation4 + $0x1f8] sm:$0xff]  }
  0x29   :  { %897 = vmatpush3.bf16.msra.mxu0 %v1002_v24  ;;  %v1048_v24 = vld [vmem:[#allocation4 + $0x138] sm:$0xff]  }
  0x2a   :  { %919 = vmatpush3.bf16.msra.mxu1 %v1003_v25  ;;  %898 = vmatprep.subr.bf16.mxu0 %v1004_v29  ;;  %v224_v25 = vrot.slane %v209_v21, %v1120_v39  ;;  %v1049_v26 = vld [vmem:[#allocation4 + $0x1b8] sm:$0xff]  }
  0x2b   :  { %920 = vmatprep.subr.bf16.mxu1 %v1005_v30 }
  0x2c   :  { %v240_v27 = vcombine.high %v224_v25, %v224_v25 }
  0x2d   :  { %899 = vmatpush3.bf16.msra.mxu0 %v1006_v31 }
  0x2e   :  { %921 = vmatpush3.bf16.msra.mxu1 %v1007_v32  ;;  %900 = vmatprep.subr.bf16.mxu0 %v1008_v35 }
  0x2f   :  { %922 = vmatprep.subr.bf16.mxu1 %v1009_v36 }
  0x31   :  { %901 = vmatpush3.bf16.msra.mxu0 %v1010_v37 }
  0x32   :  { %923 = vmatpush3.bf16.msra.mxu1 %v1011_v38  ;;  %930 = vmatprep.subr.bf16.mxu0 %v1018_v45 }
  0x33   :  { %952 = vmatprep.subr.bf16.mxu1 %v1019_v48 }
  0x34   :  { %668 = vmatmul.mubr.bf16.vlgmr.msra.gmra.mrb[0].mxu0 %v217_v54 }
  0x35   :  { %931 = vmatpush3.bf16.msra.mxu0 %v1020_v55  ;;  %708 = vmatmul.mubr.bf16.vlgmr.msra.gmra.mrb[0].mxu1 %v239_v59 }
  0x36   :  { %932 = vmatprep.subr.bf16.mxu0 %v1022_v57  ;;  %953 = vmatpush3.bf16.msra.mxu1 %v1021_v60 }
  0x37   :  { %747 = vmatprep.mubr.bf16.mxu0 %v238_v56  ;;  %954 = vmatprep.subr.bf16.mxu1 %v1023_v61 }
  0x38   :  { %787 = vmatprep.mubr.bf16.mxu1 %v242_v62 }
  0x39   :  { %933 = vmatpush3.bf16.msra.mxu0 %v1024_v63 }
  0x3a   :  { %934 = vmatprep.subr.bf16.mxu0 %v1026_v0  ;;  %955 = vmatpush3.bf16.msra.mxu1 %v1025_v1 }
  0x3b   :  { %956 = vmatprep.subr.bf16.mxu1 %v1027_v2 }
  0x3d   :  { %935 = vmatpush3.bf16.msra.mxu0 %v1028_v3 }
  0x3e   :  { %936 = vmatprep.subr.bf16.mxu0 %v1030_v4  ;;  %957 = vmatpush3.bf16.msra.mxu1 %v1029_v5 }
  0x3f   :  { %958 = vmatprep.subr.bf16.mxu1 %v1031_v6 }
  0x41   :  { %937 = vmatpush3.bf16.msra.mxu0 %v1032_v7 }
  0x42   :  { %938 = vmatprep.subr.bf16.mxu0 %v1034_v8  ;;  %959 = vmatpush3.bf16.msra.mxu1 %v1033_v9 }
  0x43   :  { %960 = vmatprep.subr.bf16.mxu1 %v1035_v10 }
  0x45   :  { %939 = vmatpush3.bf16.msra.mxu0 %v1036_v11 }
  0x46   :  { %940 = vmatprep.subr.bf16.mxu0 %v1038_v12  ;;  %961 = vmatpush3.bf16.msra.mxu1 %v1037_v13 }
  0x47   :  { %962 = vmatprep.subr.bf16.mxu1 %v1039_v14 }
  0x49   :  { %941 = vmatpush3.bf16.msra.mxu0 %v1040_v15 }
  0x4a   :  { %942 = vmatprep.subr.bf16.mxu0 %v1042_v16  ;;  %963 = vmatpush3.bf16.msra.mxu1 %v1041_v17 }
  0x4b   :  { %964 = vmatprep.subr.bf16.mxu1 %v1043_v18 }
  0x4d   :  { %943 = vmatpush3.bf16.msra.mxu0 %v1044_v19 }
  0x4e   :  { %944 = vmatprep.subr.bf16.mxu0 %v1046_v20  ;;  %965 = vmatpush3.bf16.msra.mxu1 %v1045_v22 }
  0x4f   :  { %966 = vmatprep.subr.bf16.mxu1 %v1047_v23  ;;  %s975_s1 = spop %974 }
  0x50   :  { %v813_v52 = vstv %s975_s1 }
  0x51   :  { %945 = vmatpush3.bf16.msra.mxu0 %v1048_v24 }
  0x52   :  { %967 = vmatpush3.bf16.msra.mxu1 %v1049_v26 }
  0x54   :  { %748 = vmatmul.mubr.bf16.vlgmr.msra.gmra.mrb[4].mxu0 %v224_v25 }
  0x55   :  { %788 = vmatmul.mubr.bf16.vlgmr.msra.gmra.mrb[4].mxu1 %v240_v27 }
 0x107   :  { %v902_v28 = vpop.f32.mrb[0].mxu0 }
 0x108   :  { %v903_v29 = vpop.f32.mrb[1].mxu0  ;;  %v924_v30 = vpop.f32.mrb[0].mxu1 }
 0x109   :  { %v904_v31 = vadd.f32 %v903_v29, %v902_v28  ;;  %v905_v32 = vpop.f32.mrb[2].mxu0  ;;  %v925_v33 = vpop.f32.mrb[1].mxu1 }
 0x10a   :  { %v906_v34 = vpop.f32.mrb[3].mxu0  ;;  %v926_v35 = vadd.f32 %v925_v33, %v924_v30  ;;  %v927_v36 = vpop.f32.mrb[2].mxu1 }
 0x10b   :  { %v928_v37 = vpop.f32.mrb[3].mxu1 }
 0x10c   :  { %v710_v38 = vadd.f32 %v926_v35, %v904_v31 }
 0x127   :  { %v946_v39 = vpop.f32.mrb[4].mxu0 }
 0x128   :  { %v947_v40 = vpop.f32.mrb[5].mxu0  ;;  %v968_v41 = vpop.f32.mrb[4].mxu1 }
 0x129   :  { %v948_v42 = vadd.f32 %v947_v40, %v946_v39  ;;  %v949_v43 = vpop.f32.mrb[6].mxu0  ;;  %v969_v44 = vpop.f32.mrb[5].mxu1 }
 0x12a   :  { %v950_v45 = vpop.f32.mrb[7].mxu0  ;;  %v970_v47 = vadd.f32 %v969_v44, %v968_v41  ;;  %v971_v48 = vpop.f32.mrb[6].mxu1 }
 0x12b   :  { %v750_v46 = vadd.f32 %v948_v42, %v710_v38  ;;  %v972_v49 = vpop.f32.mrb[7].mxu1 }
 0x12d   :  { %v790_v51 = vadd.f32 %v970_v47, %v750_v46 }
 0x12f   :  { %v812_v53 = vadd.f32 %v885_v50, %v790_v51 }
 0x131   :  { %v814_v54 = vmul.f32 %v813_v52, %v812_v53 }
 0x133   :  { %815 = vst [vmem:[%s1160_s4] sm:$0xff] %v814_v54 }
 0x134   :  { %820 = vsyncpa [#allocation5], 1 }

</bundles_post_ra>
